<compile_context>
chip_gen: v7x
topology: tpu7x:2x2x1
jax: 0.10.0
libtpu: 0.0.40
codegen_flags: <defaults>
</compile_context>

<pallas_src>
import jax
import jax.numpy as jnp
from jax.experimental import pallas as pl
from jax.experimental.pallas import tpu as pltpu

# Deterministic "parameters" of the synthetic transform pipeline.
SCALE0 = 1.5
SHIFT0 = 0.25
THRESH = 1.0
SCALE2 = 0.5
FILL_MASKED = True
FILL_VALUE = 0.0

MASK_DTYPE = jnp.uint8          # 1-byte mask output; values are {0, 1}
_LANE_CANDIDATES = (1024, 512, 256, 128)


# --------------------------------------------------------------------------
# Kernels
# --------------------------------------------------------------------------
def _compose_kernel_with_mask(x_ref, m_ref, xo_ref, mo_ref):
    x = x_ref[...].astype(jnp.float32)
    m_nonzero = m_ref[...] != 0

    # t0: affine on x, mask passthrough
    x = x * SCALE0 + SHIFT0
    # t1: drop out-of-range values from the mask, x passthrough
    keep = jnp.logical_and(m_nonzero, jnp.abs(x) <= THRESH)
    # t2: rescale x, mask passthrough
    x = x * SCALE2
    # fill_masked: x[mask == 0] = value
    if FILL_MASKED:
        x = jnp.where(keep, x, jnp.float32(FILL_VALUE))

    xo_ref[...] = x.astype(xo_ref.dtype)
    mo_ref[...] = keep.astype(mo_ref.dtype)


def _compose_kernel_no_mask(x_ref, xo_ref, mo_ref):
    # mask = ones_like(x) synthesized in-kernel -> no ones-array HBM read.
    x = x_ref[...].astype(jnp.float32)

    x = x * SCALE0 + SHIFT0
    keep = jnp.abs(x) <= THRESH          # ones * in_range == in_range
    x = x * SCALE2
    if FILL_MASKED:
        x = jnp.where(keep, x, jnp.float32(FILL_VALUE))

    xo_ref[...] = x.astype(xo_ref.dtype)
    mo_ref[...] = keep.astype(mo_ref.dtype)


# --------------------------------------------------------------------------
# Layout / tiling helpers
# --------------------------------------------------------------------------
def _tpu_budget():
    """(tile_bytes for the f32 x-tile, vmem_limit_bytes) from chip VMEM size."""
    try:
        vmem = pltpu.get_tpu_info().vmem_capacity_bytes
    except Exception:
        vmem = 64 * 1024 * 1024                 # conservative (v7x-sized)
    if vmem >= 128 * 1024 * 1024:               # v5e / v6e
        return 4 * 1024 * 1024, 64 * 1024 * 1024
    return 2 * 1024 * 1024, 32 * 1024 * 1024    # v7x or unknown


def _choose_lane(n):
    """Lane width (multiple of 128) for a copy-free (rows, lane) reshape.

    Prefers the largest lane that divides n with >= 8 rows (full sublanes);
    falls back to any dividing lane; else a padded 128-lane layout.
    Returns (lane, rows, needs_pad).
    """
    for lane in _LANE_CANDIDATES:
        if n % lane == 0 and n // lane >= 8:
            return lane, n // lane, False
    for lane in _LANE_CANDIDATES:
        if n % lane == 0:
            return lane, n // lane, False
    lane = 128
    rows = -(-n // lane)
    return lane, rows, True


def _choose_block_rows(rows, lane, tile_bytes):
    max_rows = tile_bytes // (lane * 4)         # sized against the f32 x tile
    if rows <= max_rows:
        return rows                             # full extent -> always legal
    # Multiple of 32 keeps both f32 (8-sublane) and uint8 (32-sublane packed)
    # blocks natively tileable when the block is not the full extent.
    return max(32, (max_rows // 32) * 32)


# --------------------------------------------------------------------------
# Wrapper
# --------------------------------------------------------------------------
def with_mask_compose(x, mask=None):
    """x: any-shaped float array (e.g. (B,C,H,W)). mask: same shape or None.

    Returns (x_out, mask_out). mask_out is uint8 with values {0, 1}.
    """
    n = x.size
    lane, rows, needs_pad = _choose_lane(n)
    tile_bytes, vmem_limit = _tpu_budget()
    block_rows = _choose_block_rows(rows, lane, tile_bytes)
    grid = (pl.cdiv(rows, block_rows),)
    spec = pl.BlockSpec((block_rows, lane), lambda i: (i, 0))

    def to2d(a):
        flat = a.reshape(-1)
        if needs_pad:
            flat = jnp.pad(flat, (0, rows * lane - n))
        return flat.reshape(rows, lane)

    x2d = to2d(x)

    out_shape = (
        jax.ShapeDtypeStruct((rows, lane), x.dtype),
        jax.ShapeDtypeStruct((rows, lane), MASK_DTYPE),
    )
    compiler_params = pltpu.CompilerParams(
        dimension_semantics=("parallel",),
        vmem_limit_bytes=vmem_limit,
    )

    if mask is None:
        xo, mo = pl.pallas_call(
            _compose_kernel_no_mask,
            out_shape=out_shape,
            grid=grid,
            in_specs=[spec],
            out_specs=(spec, spec),
            compiler_params=compiler_params,
        )(x2d)
    else:
        m2d = to2d(mask)
        xo, mo = pl.pallas_call(
            _compose_kernel_with_mask,
            out_shape=out_shape,
            grid=grid,
            in_specs=[spec, spec],
            out_specs=(spec, spec),
            compiler_params=compiler_params,
        )(x2d, m2d)

    if needs_pad:
        x_out = xo.reshape(-1)[:n].reshape(x.shape)
        m_out = mo.reshape(-1)[:n].reshape(x.shape)
    else:
        x_out = xo.reshape(x.shape)
        m_out = mo.reshape(x.shape)
    return x_out, m_out


# --------------------------------------------------------------------------
# Pure-JAX reference (mirrors the original module's forward with the same
# synthetic transform pipeline) and self-test.
# --------------------------------------------------------------------------
def _reference(x, mask=None):
    if mask is None:
        mask = jnp.ones_like(x)
    mask = mask.astype(x.dtype)
    x = x * SCALE0 + SHIFT0
    mask = mask * (jnp.abs(x) <= THRESH).astype(mask.dtype)
    x = x * SCALE2
    if FILL_MASKED:
        x = jnp.where(mask == 0, jnp.asarray(FILL_VALUE, x.dtype), x)
    return x, mask


def _check(x, mask, tag):
    x_out, m_out = with_mask_compose(x, mask)
    jax.block_until_ready((x_out, m_out))
    x_ref, m_ref = _reference(x, mask)
    assert x_out.shape == x.shape and m_out.shape == x.shape
    assert jnp.allclose(x_out, x_ref, atol=1e-6), f"x mismatch ({tag})"
    # mask is returned as binary uint8; reference masks here are binary too.
    assert jnp.allclose(m_out.astype(jnp.float32),
                        m_ref.astype(jnp.float32), atol=1e-6), \
        f"mask mismatch ({tag})"


if __name__ == "__main__":
    key = jax.random.PRNGKey(0)
    kx, km, kx2, km2 = jax.random.split(key, 4)

    # Main shape: (B,C,H,W) = (2,4,16,16) -> 2048 elems, copy-free (8,256) tile.
    B, C, H, W = 2, 4, 16, 16
    x = jax.random.normal(kx, (B, C, H, W), dtype=jnp.float32)
    mask_u8 = (jax.random.uniform(km, (B, C, H, W)) > 0.2).astype(jnp.uint8)

    _check(x, None, "mask=None")           # fast path, no mask read
    _check(x, mask_u8, "uint8 mask")       # 1-byte mask read path

    # Ragged shape (size not a multiple of 128) exercises the pad fallback,
    # with an f32 mask input.
    x_r = jax.random.normal(kx2, (2, 3, 11, 13), dtype=jnp.float32)
    mask_f32 = (jax.random.uniform(km2, (2, 3, 11, 13)) > 0.3).astype(jnp.float32)
    _check(x_r, mask_f32, "ragged + f32 mask")

    print("KERNEL_OK")
</pallas_src>

<mosaic_0001>
module attributes {stable_mosaic.version = 11 : i64} {
  func.func @_compose_kernel_no_mask(%arg0: i32, %arg1: memref<8x256xf32, #tpu.memory_space<vmem>>, %arg2: memref<8x256xf32, #tpu.memory_space<vmem>>, %arg3: memref<8x256xi8, #tpu.memory_space<vmem>>) attributes {dimension_semantics = [#tpu.dimension_semantics<parallel>], iteration_bounds = array<i64: 1>, scalar_prefetch = 0 : i64, scratch_operands = 0 : i64, tpu.core_type = #tpu.core_type<tc>, window_params = [{transform_indices = @transform_0, window_bounds = array<i64: 8, 256>}, {transform_indices = @transform_1, window_bounds = array<i64: 8, 256>}, {transform_indices = @transform_2, window_bounds = array<i64: 8, 256>}]} {
    %c0 = arith.constant 0 : index
    %c0_0 = arith.constant 0 : index
    %0 = vector.load %arg1[%c0, %c0_0] : memref<8x256xf32, #tpu.memory_space<vmem>>, vector<8x256xf32>
    %cst = arith.constant 1.500000e+00 : f32
    %1 = vector.broadcast %cst : f32 to vector<8x256xf32>
    %2 = arith.mulf %0, %1 : vector<8x256xf32>
    %cst_1 = arith.constant 2.500000e-01 : f32
    %3 = vector.broadcast %cst_1 : f32 to vector<8x256xf32>
    %4 = arith.addf %2, %3 : vector<8x256xf32>
    %5 = math.absf %4 : vector<8x256xf32>
    %cst_2 = arith.constant 1.000000e+00 : f32
    %6 = vector.broadcast %cst_2 : f32 to vector<8x256xf32>
    %7 = arith.cmpf ole, %5, %6 : vector<8x256xf32>
    %cst_3 = arith.constant 5.000000e-01 : f32
    %8 = vector.broadcast %cst_3 : f32 to vector<8x256xf32>
    %9 = arith.mulf %4, %8 : vector<8x256xf32>
    %cst_4 = arith.constant 0.000000e+00 : f32
    %10 = vector.broadcast %cst_4 : f32 to vector<8x256xf32>
    %11 = arith.select %7, %9, %10 : vector<8x256xi1>, vector<8x256xf32>
    %c0_5 = arith.constant 0 : index
    %c0_6 = arith.constant 0 : index
    %12 = vector.load %arg2[%c0_5, %c0_6] : memref<8x256xf32, #tpu.memory_space<vmem>>, vector<8x256xf32>
    tpu.vector_store %arg2[%c0_5, %c0_6], %11 {strides = array<i32>} : memref<8x256xf32, #tpu.memory_space<vmem>>, vector<8x256xf32>,
    %13 = arith.extui %7 : vector<8x256xi1> to vector<8x256xi8>
    %c0_7 = arith.constant 0 : index
    %c0_8 = arith.constant 0 : index
    %14 = vector.load %arg3[%c0_7, %c0_8] : memref<8x256xi8, #tpu.memory_space<vmem>>, vector<8x256xi8>
    tpu.vector_store %arg3[%c0_7, %c0_8], %13 {strides = array<i32>} : memref<8x256xi8, #tpu.memory_space<vmem>>, vector<8x256xi8>,
    return
  }
  func.func @transform_0(%arg0: i32) -> (i32, i32) {
    %c0_i32 = arith.constant 0 : i32
    %c0_i32_0 = arith.constant 0 : i32
    return %arg0, %c0_i32 : i32, i32
  }
  func.func @transform_1(%arg0: i32) -> (i32, i32) {
    %c0_i32 = arith.constant 0 : i32
    %c0_i32_0 = arith.constant 0 : i32
    return %arg0, %c0_i32 : i32, i32
  }
  func.func @transform_2(%arg0: i32) -> (i32, i32) {
    %c0_i32 = arith.constant 0 : i32
    %c0_i32_0 = arith.constant 0 : i32
    return %arg0, %c0_i32 : i32, i32
  }
}

</mosaic_0001>

<bundles_post_ra>
// kernel: tpu_custom_call.1
= control target key start
LH: loop header
LB: loop body
LE: loop exit
PB: predicated region body
PF: predicated region fallthrough
CT: control target
= control target key end

     0   :  { %8 = vsyncpa [#allocation3], 0  ;;  %s222_s0 = inlined_call_operand.hbm [shape: f32[8,256], index: 0, kind: input, shape index: {}]   ;;  %s223_s1 = inlined_call_operand.hbm [shape: f32[8,256], index: 1, kind: output, shape index: {0}]   ;;  %s224_s2 = inlined_call_operand.hbm [shape: u8[8,256], index: 2, kind: output, shape index: {1}]  }
   0x1   :  { %9 = vsyncpa [#allocation4], 0 }
   0x2   :  { %10 = vsyncpa [#allocation7], 0  ;;  %s158_s9 = smov [#allocation2]   ;;  %s86_s13 = scalar_lea.hbm %s222_s0, 256 }
   0x3   :  { %s17_s10 = sshll.u32 %s158_s9, 4  ;;  %p87_p0 = scmp.ne.s32.totalorder %s222_s0, %s86_s13  ;;  %s18_s10 = int_to_ptr.vmem [resolvable:$true] %s17_s10 }
   0x4   :  { %p90_p1 = scmp.lt.u32.totalorder %s86_s13, %s222_s0 }
   0x6   :  { %p92_p2 = pnand %p90_p1, %p87_p0 }
   0x8   :  { %95 = shalt.err (!%p92_p2)
}
   0x9   :  { %s96_s18 = scalar_lea.vmem %s18_s10, 256  ;;  %p101_p4 = scmp.lt.s32.totalorder %s18_s10, %s18_s10 }
   0xa   :  { %p97_p3 = scmp.ne.s32.totalorder %s18_s10, %s96_s18  ;;  %p102_p5 = scmp.lt.s32.totalorder %s96_s18, %s96_s18 }
   0xc   :  { %p103_p6 = por %p102_p5, %p101_p4 }
   0xe   :  { %p104_p7 = pnand %p103_p6, %p97_p3 }
  0x10   :  { %107 = shalt.err (!%p104_p7)
}
  0x11   :  { %20 = dma.hbm_to_vmem [thread:$0]  %s222_s0, 256, %s18_s10, [#allocation3]  }
  0x12   :  { %152 = dma.done.wait [#allocation3], 256  }
  0x13   :  { %153 = vsyncadd [#allocation3], 4294967040  ;;  %v26_v0 = vld [vmem:[#allocation2] sm:$0xff]  ;;  %v27_v1 = vld [vmem:[#allocation2 + $0x8] sm:$0xff]  ;;  %s159_s21 = smov [#allocation5]   ;;  %v160_v13 = vmov 0  }
  0x14   :  { %v28_v2 = vmul.f32 1.5, %v26_v0  ;;  %v29_v3 = vmul.f32 1.5, %v27_v1  ;;  %s59_s22 = sshll.u32 %s159_s21, 4  ;;  %s60_s22 = int_to_ptr.vmem [resolvable:$true] %s59_s22 }
  0x15   :  { %s108_s0 = scalar_lea.vmem %s60_s22, 256  ;;  %p113_p9 = scmp.lt.s32.totalorder %s60_s22, %s60_s22 }
  0x16   :  { %v30_v4 = vadd.f32 0.25, %v28_v2  ;;  %v31_v5 = vadd.f32 0.25, %v29_v3  ;;  %p109_p8 = scmp.ne.s32.totalorder %s60_s22, %s108_s0  ;;  %p114_p10 = scmp.lt.s32.totalorder %s108_s0, %s108_s0 }
  0x18   :  { %v32_v6 = vand.u32 2147483647, %v30_v4  ;;  %v36_v7 = vmul.f32 0.5, %v30_v4  ;;  %v33_v8 = vand.u32 2147483647, %v31_v5  ;;  %v37_v9 = vmul.f32 0.5, %v31_v5  ;;  %p115_p11 = por %p114_p10, %p113_p9 }
  0x1a   :  { %vm34_vm0 = vcmp.le.f32.partialorder %v32_v6, 1.0  ;;  %vm189_vm1 = vcmp.le.f32.partialorder %v33_v8, 1.0  ;;  %p116_p12 = pnand %p115_p11, %p109_p8 }
  0x1b   :  { %v38_v11 = vsel %vm34_vm0, %v36_v7, 0.0  ;;  %vm42_vm2 = vmpackc.low %vm34_vm0, %vm34_vm0  ;;  %v39_v12 = vsel %vm189_vm1, %v37_v9, 0.0 }
  0x1c   :  { %40 = vst [vmem:[#allocation5] sm:$0xff] %v38_v11  ;;  %vm43_vm3 = vmpackc.even %vm42_vm2, %vm42_vm2 }
  0x1d   :  { %41 = vst [vmem:[#allocation5 + $0x8] sm:$0xff] %v39_v12  ;;  %v46_v14 = vsel %vm43_vm3, 16843009, %v160_v13  ;;  %vm44_vm4 = vmpackc.low %vm189_vm1, %vm189_vm1 }
  0x1e   :  { %119 = shalt.err (!%p116_p12)
}
  0x1f   :  { %s120_s25 = scalar_lea.hbm %s223_s1, 256 }
  0x20   :  { %p121_p13 = scmp.ne.s32.totalorder %s223_s1, %s120_s25  ;;  %p124_p0 = scmp.lt.u32.totalorder %s120_s25, %s223_s1 }
  0x22   :  { %p126_p1 = pnand %p124_p0, %p121_p13 }
  0x24   :  { %129 = shalt.err (!%p126_p1)
}
  0x25   :  { %62 = dma.vmem_to_hbm [thread:$0]  %s60_s22, 256, %s223_s1, [#allocation4]   ;;  %vm45_vm5 = vmpackc.even %vm44_vm4, %vm44_vm4  ;;  %v48_v15 = vunpack.c.0.s8 %v46_v14 }
  0x26   :  { %v47_v16 = vsel %vm45_vm5, 16843009, %v160_v13  ;;  %s161_s4 = smov [#allocation6]  }
  0x27   :  { %v49_v17 = vunpack.c.0.s8 %v47_v16  ;;  %s69_s5 = sshll.u32 %s161_s4, 4  ;;  %s70_s5 = int_to_ptr.vmem [resolvable:$true] %s69_s5 }
  0x28   :  { %s130_s6 = scalar_lea.vmem %s70_s5, 64  ;;  %p135_p3 = scmp.lt.s32.totalorder %s70_s5, %s70_s5 }
  0x29   :  { %v50_v18 = vpack.c.b16 %v49_v17, %v48_v15  ;;  %p131_p2 = scmp.ne.s32.totalorder %s70_s5, %s130_s6  ;;  %p136_p4 = scmp.lt.s32.totalorder %s130_s6, %s130_s6 }
  0x2b   :  { %v51_v19 = vpack.c.b8 %v50_v18, %v50_v18  ;;  %p137_p5 = por %p136_p4, %p135_p3 }
  0x2d   :  { %52 = vst [vmem:[#allocation6] sm:$0xf] %v51_v19  ;;  %p138_p6 = pnand %p137_p5, %p131_p2 }
  0x2f   :  { %141 = shalt.err (!%p138_p6)
}
  0x30   :  { %s142_s1 = scalar_lea.hbm %s224_s2, 64 }
  0x31   :  { %p143_p7 = scmp.ne.s32.totalorder %s224_s2, %s142_s1  ;;  %p146_p8 = scmp.lt.u32.totalorder %s142_s1, %s224_s2 }
  0x33   :  { %p148_p9 = pnand %p146_p8, %p143_p7 }
  0x35   :  { %151 = shalt.err (!%p148_p9)
}
  0x36   :  { %72 = dma.vmem_to_hbm [thread:$0]  %s70_s5, 64, %s224_s2, [#allocation7]  }
  0x37   :  { %154 = dma.done.wait [#allocation4], 256  }
  0x38   :  { %155 = vsyncadd [#allocation4], 4294967040 }
  0x39   :  { %156 = dma.done.wait [#allocation7], 64  }
  0x3a   :  { %157 = vsyncadd [#allocation7], 4294967232 }
  0x3b   :  { %79 = vsyncpa [#allocation3], 1 }
  0x3c   :  { %80 = vsyncpa [#allocation4], 1 }
  0x3d   :  { %81 = vsyncpa [#allocation7], 1 }

</bundles_post_ra>
